<compile_context>
chip_gen: v7x
topology: tpu7x:2x2x1
jax: 0.10.0
libtpu: 0.0.40
codegen_flags: <defaults>
</compile_context>

<pallas_src>
import functools

import jax
import jax.numpy as jnp
from jax.experimental import pallas as pl
from jax.experimental.pallas import tpu as pltpu

_LANES = 128
_MAX_TILE_ROWS = 4096            # 4096*128*4B = 2 MiB per f32 tile
_VMEM_LIMIT = 32 * 1024 * 1024   # headroom over v5e's 16 MiB default; <= all physical


def _sum_kernel(x_ref, mean_ref, acc_ref, *, inv_n):
    """Pass 1: per-outer-index partial mean over the inner (reduction) axis."""
    t = pl.program_id(1)

    @pl.when(t == 0)
    def _():
        acc_ref[...] = jnp.zeros_like(acc_ref)

    # Lane-wise f32 accumulation each step; cross-lane reduce only at the end.
    acc_ref[...] += jnp.sum(x_ref[...].astype(jnp.float32), axis=0,
                            keepdims=True)

    @pl.when(t == pl.num_programs(1) - 1)
    def _():
        partial_mean = jnp.sum(acc_ref[...]) * inv_n
        mean_ref[...] = jnp.broadcast_to(partial_mean, (8, _LANES))


def _center_kernel(means_ref, x_ref, o_ref, *, num_partials):
    """Pass 2: out = x - mean, written in the input's native dtype."""
    mu = means_ref[0, 0]
    for i in range(1, num_partials):          # num_partials is a compile-time int
        mu = mu + means_ref[8 * i, 0]
    o_ref[...] = (x_ref[...].astype(jnp.float32) - mu).astype(o_ref.dtype)


def _round_up(v, m):
    return ((v + m - 1) // m) * m


def centered_layer(x, *, max_tile_rows=_MAX_TILE_ROWS):
    """Pallas implementation of CenteredLayer.forward: x - x.mean()."""
    orig_shape = x.shape
    dtype = x.dtype
    n = x.size
    inv_n = 1.0 / float(n)

    rows_exact = n // _LANES
    fast = (n % _LANES == 0) and (rows_exact <= max_tile_rows
                                  or rows_exact % 8 == 0)

    if fast:
        # Free reshape to a lane-dense (rows, 128) view; no pad, no copy.
        rows = rows_exact
        if rows <= max_tile_rows:
            tr = rows                      # single full-array block
        else:
            tr = (max_tile_rows // 8) * 8  # largest multiple-of-8 divisor <= max
            while rows % tr:
                tr -= 8
        x2d = x.reshape(rows, _LANES)
        padded = False
    else:
        # Ragged tail: zero-pad the flat vector (sum stays exact, we divide by n).
        rows_needed = pl.cdiv(n, _LANES)
        tr = min(max_tile_rows, _round_up(max(rows_needed, 1), 8))
        rows = _round_up(rows_needed, tr)
        flat = jnp.pad(x.reshape(-1), (0, rows * _LANES - n))
        x2d = flat.reshape(rows, _LANES)
        padded = True

    num_tiles = rows // tr
    # Megacore-friendly reduction: shard the outer axis across TensorCores
    # (v7x has 2 TCs); inner axis is the sequential accumulation.
    split = 2 if (num_tiles >= 2 and num_tiles % 2 == 0) else 1
    inner = num_tiles // split

    # ---- Pass 1: partial means (one lane-dense (8,128) slab per split) ----
    partial_means = pl.pallas_call(
        functools.partial(_sum_kernel, inv_n=inv_n),
        out_shape=jax.ShapeDtypeStruct((split * 8, _LANES), jnp.float32),
        grid=(split, inner),
        in_specs=[pl.BlockSpec((tr, _LANES),
                               lambda c, t: (c * inner + t, 0))],
        out_specs=pl.BlockSpec((8, _LANES), lambda c, t: (c, 0)),
        scratch_shapes=[pltpu.VMEM((1, _LANES), jnp.float32)],
        compiler_params=pltpu.CompilerParams(
            dimension_semantics=("parallel", "arbitrary"),
            vmem_limit_bytes=_VMEM_LIMIT),
    )(x2d)

    # ---- Pass 2: subtract the mean (partial means read from SMEM) ----
    out2d = pl.pallas_call(
        functools.partial(_center_kernel, num_partials=split),
        out_shape=jax.ShapeDtypeStruct((rows, _LANES), dtype),
        grid=(num_tiles,),
        in_specs=[
            pl.BlockSpec(memory_space=pltpu.MemorySpace.SMEM),
            pl.BlockSpec((tr, _LANES), lambda i: (i, 0)),
        ],
        out_specs=pl.BlockSpec((tr, _LANES), lambda i: (i, 0)),
        compiler_params=pltpu.CompilerParams(
            dimension_semantics=("parallel",),
            vmem_limit_bytes=_VMEM_LIMIT),
    )(partial_means, x2d)

    if padded:
        return out2d.reshape(-1)[:n].reshape(orig_shape)
    return out2d.reshape(orig_shape)


if __name__ == "__main__":
    key = jax.random.PRNGKey(0)
    k0, k1, k2 = jax.random.split(key, 3)

    # 1) Small shape consistent with the module (x = torch.ones(1, 4)),
    #    batched to (2, 4): exercises the ragged (padded) path.
    x_small = jax.random.normal(k0, (2, 4), dtype=jnp.float32)
    out_small = jax.block_until_ready(centered_layer(x_small))
    ref_small = x_small - jnp.mean(x_small)
    assert out_small.shape == x_small.shape
    assert out_small.dtype == x_small.dtype
    assert jnp.allclose(out_small, ref_small, atol=1e-5, rtol=1e-5)
    assert abs(float(jnp.mean(out_small))) < 1e-5

    # 2) Lane-aligned shape: exercises the no-pad / no-slice fast path.
    x_fast = jax.random.normal(k1, (16, 512), dtype=jnp.float32)
    out_fast = jax.block_until_ready(centered_layer(x_fast))
    ref_fast = x_fast - jnp.mean(x_fast)
    assert jnp.allclose(out_fast, ref_fast, atol=1e-5, rtol=1e-5)

    # 3) bf16 input: native-dtype DMA, in-kernel f32 accumulation, bf16 output.
    x_bf16 = jax.random.normal(k2, (8, 256), dtype=jnp.bfloat16)
    out_bf16 = jax.block_until_ready(centered_layer(x_bf16))
    ref_bf16 = (x_bf16.astype(jnp.float32)
                - jnp.mean(x_bf16.astype(jnp.float32))).astype(jnp.bfloat16)
    assert out_bf16.dtype == jnp.bfloat16
    assert jnp.allclose(out_bf16.astype(jnp.float32),
                        ref_bf16.astype(jnp.float32), atol=1e-2, rtol=1e-2)

    print("KERNEL_OK")
</pallas_src>

<mosaic_0001>
module attributes {stable_mosaic.version = 11 : i64} {
  func.func @_sum_kernel(%arg0: i32, %arg1: i32, %arg2: memref<8x128xf32, #tpu.memory_space<vmem>>, %arg3: memref<8x128xf32, #tpu.memory_space<vmem>>, %arg4: memref<1x128xf32, #tpu.memory_space<vmem>>) attributes {dimension_semantics = [#tpu.dimension_semantics<parallel>, #tpu.dimension_semantics<arbitrary>], iteration_bounds = array<i64: 1, 1>, scalar_prefetch = 0 : i64, scratch_operands = 1 : i64, tpu.core_type = #tpu.core_type<tc>, window_params = [{transform_indices = @transform_0, window_bounds = array<i64: 8, 128>}, {transform_indices = @transform_1, window_bounds = array<i64: 8, 128>}]} {
    %c0_i32 = arith.constant 0 : i32
    %0 = arith.cmpi eq, %arg1, %c0_i32 : i32
    %1 = arith.extui %0 : i1 to i32
    %c0_i32_0 = arith.constant 0 : i32
    %2 = arith.cmpi ne, %1, %c0_i32_0 : i32
    scf.if %2 {
      %cst_8 = arith.constant 0.000000e+00 : f32
      %12 = vector.broadcast %cst_8 : f32 to vector<1x128xf32>
      %c0_9 = arith.constant 0 : index
      %c0_10 = arith.constant 0 : index
      %13 = vector.load %arg4[%c0_9, %c0_10] : memref<1x128xf32, #tpu.memory_space<vmem>>, vector<1x128xf32>
      tpu.vector_store %arg4[%c0_9, %c0_10], %12 {strides = array<i32>} : memref<1x128xf32, #tpu.memory_space<vmem>>, vector<1x128xf32>,
    } else {
    }
    %c0 = arith.constant 0 : index
    %c0_1 = arith.constant 0 : index
    %3 = vector.load %arg4[%c0, %c0_1] : memref<1x128xf32, #tpu.memory_space<vmem>>, vector<1x128xf32>
    %c0_2 = arith.constant 0 : index
    %c0_3 = arith.constant 0 : index
    %4 = vector.load %arg2[%c0_2, %c0_3] : memref<8x128xf32, #tpu.memory_space<vmem>>, vector<8x128xf32>
    %cst = arith.constant dense<0.000000e+00> : vector<128xf32>
    %5 = vector.multi_reduction <add>, %4, %cst [0] : vector<8x128xf32> to vector<128xf32>
    %6 = vector.shape_cast %5 : vector<128xf32> to vector<1x128xf32>
    %7 = arith.addf %3, %6 : vector<1x128xf32>
    %c0_4 = arith.constant 0 : index
    %c0_5 = arith.constant 0 : index
    %8 = vector.load %arg4[%c0_4, %c0_5] : memref<1x128xf32, #tpu.memory_space<vmem>>, vector<1x128xf32>
    tpu.vector_store %arg4[%c0_4, %c0_5], %7 {strides = array<i32>} : memref<1x128xf32, #tpu.memory_space<vmem>>, vector<1x128xf32>,
    %c0_i32_6 = arith.constant 0 : i32
    %9 = arith.cmpi eq, %arg1, %c0_i32_6 : i32
    %10 = arith.extui %9 : i1 to i32
    %c0_i32_7 = arith.constant 0 : i32
    %11 = arith.cmpi ne, %10, %c0_i32_7 : i32
    scf.if %11 {
      %c0_8 = arith.constant 0 : index
      %c0_9 = arith.constant 0 : index
      %12 = vector.load %arg4[%c0_8, %c0_9] : memref<1x128xf32, #tpu.memory_space<vmem>>, vector<1x128xf32>
      %13 = vector.shape_cast %12 : vector<1x128xf32> to vector<1x1x128xf32>
      %cst_10 = arith.constant dense<0.000000e+00> : vector<1xf32>
      %14 = vector.multi_reduction <add>, %13, %cst_10 [1, 2] : vector<1x1x128xf32> to vector<1xf32>
      %15 = vector.shape_cast %14 : vector<1xf32> to vector<1x1x1xf32>
      %16 = vector.extract %15[0, 0, 0] : f32 from vector<1x1x1xf32>
      %cst_11 = arith.constant 1.250000e-01 : f32
      %17 = arith.mulf %16, %cst_11 : f32
      %18 = vector.broadcast %17 : f32 to vector<8x128xf32>
      %c0_12 = arith.constant 0 : index
      %c0_13 = arith.constant 0 : index
      %19 = vector.load %arg3[%c0_12, %c0_13] : memref<8x128xf32, #tpu.memory_space<vmem>>, vector<8x128xf32>
      tpu.vector_store %arg3[%c0_12, %c0_13], %18 {strides = array<i32>} : memref<8x128xf32, #tpu.memory_space<vmem>>, vector<8x128xf32>,
    } else {
    }
    return
  }
  func.func @transform_0(%arg0: i32, %arg1: i32) -> (i32, i32) {
    %c1_i32 = arith.constant 1 : i32
    %0 = arith.muli %arg0, %c1_i32 : i32
    %1 = arith.addi %0, %arg1 : i32
    %c0_i32 = arith.constant 0 : i32
    %c0_i32_0 = arith.constant 0 : i32
    return %1, %c0_i32 : i32, i32
  }
  func.func @transform_1(%arg0: i32, %arg1: i32) -> (i32, i32) {
    %c0_i32 = arith.constant 0 : i32
    %c0_i32_0 = arith.constant 0 : i32
    return %arg0, %c0_i32 : i32, i32
  }
}

</mosaic_0001>

<bundles_post_ra>
// kernel: tpu_custom_call.1
= control target key start
LH: loop header
LB: loop body
LE: loop exit
PB: predicated region body
PF: predicated region fallthrough
CT: control target
= control target key end

     0   :  { %6 = vsyncpa [#allocation4], 0  ;;  %s163_s0 = inlined_call_operand.hbm [shape: f32[8,128], index: 0, kind: input, shape index: {}]   ;;  %s164_s1 = inlined_call_operand.hbm [shape: f32[8,128], index: 1, kind: output, shape index: {}]  }
   0x1   :  { %7 = vsyncpa [#allocation5], 0  ;;  %s126_s6 = smov [#allocation3]   ;;  %s78_s10 = scalar_lea.hbm %s163_s0, 128 }
   0x2   :  { %s17_s7 = sshll.u32 %s126_s6, 4  ;;  %p79_p0 = scmp.ne.s32.totalorder %s163_s0, %s78_s10  ;;  %s18_s7 = int_to_ptr.vmem [resolvable:$true] %s17_s7 }
   0x3   :  { %p82_p1 = scmp.lt.u32.totalorder %s78_s10, %s163_s0 }
   0x5   :  { %p84_p2 = pnand %p82_p1, %p79_p0 }
   0x7   :  { %87 = shalt.err (!%p84_p2)
}
   0x8   :  { %s88_s15 = scalar_lea.vmem %s18_s7, 128  ;;  %p93_p4 = scmp.lt.s32.totalorder %s18_s7, %s18_s7 }
   0x9   :  { %p89_p3 = scmp.ne.s32.totalorder %s18_s7, %s88_s15  ;;  %p94_p5 = scmp.lt.s32.totalorder %s88_s15, %s88_s15 }
   0xb   :  { %p95_p6 = por %p94_p5, %p93_p4 }
   0xd   :  { %p96_p7 = pnand %p95_p6, %p89_p3 }
   0xf   :  { %99 = shalt.err (!%p96_p7)
}
  0x10   :  { %20 = dma.hbm_to_vmem [thread:$0]  %s163_s0, 128, %s18_s7, [#allocation4]  }
  0x11   :  { %122 = dma.done.wait [#allocation4], 128  }
  0x12   :  { %123 = vsyncadd [#allocation4], 4294967168  ;;  %v127_v0 = vmov 0.0   ;;  %v31_v1 = vld [vmem:[#allocation3] sm:$0xff]  ;;  %vm44_vm0 = vcmask 1040384   ;;  %s128_s0 = smov [#allocation6]  }
  0x13   :  { %29 = vst [vmem:[#allocation2] sm:$0x1] %v127_v0  ;;  %v32_v2 = vrot.slane %v31_v1, 4  ;;  %s64_s18 = sshll.u32 %s128_s0, 4  ;;  %s65_s18 = int_to_ptr.vmem [resolvable:$true] %s64_s18 }
  0x14   :  { %s100_s21 = scalar_lea.vmem %s65_s18, 128  ;;  %p105_p9 = scmp.lt.s32.totalorder %s65_s18, %s65_s18 }
  0x15   :  { %v33_v3 = vadd.f32 %v32_v2, %v31_v1  ;;  %p101_p8 = scmp.ne.s32.totalorder %s65_s18, %s100_s21  ;;  %p106_p10 = scmp.lt.s32.totalorder %s100_s21, %s100_s21 }
  0x17   :  { %v34_v4 = vrot.slane %v33_v3, 2  ;;  %p107_p11 = por %p106_p10, %p105_p9 }
  0x19   :  { %v35_v5 = vadd.f32 %v34_v4, %v33_v3  ;;  %p108_p12 = pnand %p107_p11, %p101_p8 }
  0x1a   :  { %v30_v7 = vld [vmem:[#allocation2] sm:$0x1] }
  0x1b   :  { %v36_v6 = vrot.slane %v35_v5, 1 }
  0x1d   :  { %v37_v8 = vadd.f32 %v36_v6, %v35_v5 }
  0x1f   :  { %v38_v9 = vadd.f32 %v37_v8, %v30_v7 }
  0x21   :  { %39 = vst [vmem:[#allocation2] sm:$0x1] %v38_v9 }
  0x28   :  { %v43_v10 = vld [vmem:[#allocation2] sm:$0x1] }
  0x29   :  { %v45_v11 = vsel %vm44_vm0, %v43_v10, 0.0 }
  0x2a   :  { %46 = vadd.xlane.f32.xlu0 %v45_v11 }
  0xb7   :  { %v47_v12 = vpop.xlane.xlu0 %46 }
  0xb8   :  { %v48_v13 = vrot.slane %v47_v12, 4 }
  0xba   :  { %v49_v14 = vadd.f32 %v48_v13, %v47_v12 }
  0xbc   :  { %v50_v15 = vrot.slane %v49_v14, 2 }
  0xbe   :  { %v51_v16 = vadd.f32 %v50_v15, %v49_v14 }
  0xc0   :  { %v52_v17 = vrot.slane %v51_v16, 1 }
  0xc2   :  { %v53_v18 = vadd.f32 %v52_v17, %v51_v16 }
  0xc4   :  { %73 = vpush %v53_v18 }
  0xf5   :  { %s74_s19 = spop %73 }
  0xf6   :  { %s55_s20 = smul.f32 0.125, %s74_s19 }
  0xf8   :  { %v56_v19 = vstv %s55_s20 }
  0xf9   :  { %57 = vst [vmem:[#allocation6] sm:$0xff] %v56_v19 }
  0xfa   :  { %111 = shalt.err (!%p108_p12)
}
  0xfb   :  { %s112_s24 = scalar_lea.hbm %s164_s1, 128 }
  0xfc   :  { %p113_p13 = scmp.ne.s32.totalorder %s164_s1, %s112_s24  ;;  %p116_p0 = scmp.lt.u32.totalorder %s112_s24, %s164_s1 }
  0xfe   :  { %p118_p1 = pnand %p116_p0, %p113_p13 }
 0x100   :  { %121 = shalt.err (!%p118_p1)
}
 0x101   :  { %67 = dma.vmem_to_hbm [thread:$0]  %s65_s18, 128, %s164_s1, [#allocation5]  }
 0x102   :  { %124 = dma.done.wait [#allocation5], 128  }
 0x103   :  { %125 = vsyncadd [#allocation5], 4294967168 }
 0x104   :  { %71 = vsyncpa [#allocation4], 1 }
 0x105   :  { %72 = vsyncpa [#allocation5], 1 }

</bundles_post_ra>
